<compile_context>
chip_gen: v5e
topology: v5e:2x2
jax: 0.10.0
libtpu: 0.0.40
codegen_flags: <defaults>
</compile_context>

<pallas_src>
import jax
import jax.numpy as jnp
from jax.experimental import pallas as pl
from jax.experimental.pallas import tpu as pltpu


def _round_up(x, m):
    return ((x + m - 1) // m) * m


def _pad2(a, rows, cols):
    pr, pc = rows - a.shape[0], cols - a.shape[1]
    if pr or pc:
        a = jnp.pad(a, ((0, pr), (0, pc)))
    return a


def vae_decoder_kernel(z_ref, w1_ref, b1_ref, w2_ref, b2_ref, out_ref):
    # fc1: hidden = sigmoid(z @ W1 + b1)   (MXU matmul, f32 accumulation)
    z = z_ref[...].astype(w1_ref.dtype)
    h = jnp.dot(z, w1_ref[...], preferred_element_type=jnp.float32)
    h = jax.nn.sigmoid(h + b1_ref[...])          # bias add + sigmoid in f32
    # fc21: loc_img = sigmoid(hidden @ W2 + b2)
    o = jnp.dot(h.astype(w2_ref.dtype), w2_ref[...],
                preferred_element_type=jnp.float32)
    out_ref[...] = jax.nn.sigmoid(o + b2_ref[...]).astype(out_ref.dtype)


def vae_decoder(z, w1, b1, w2, b2, *, block_b=256, compute_dtype=jnp.float32):
    """z: [B, z_dim]; w1: [z_dim, hidden]; b1: [hidden] or [1, hidden];
    w2: [hidden, out]; b2: [out] or [1, out]  ->  [B, out] (float32)."""
    B, Z = z.shape
    H = w1.shape[1]
    O = w2.shape[1]

    # Lane-dense (multiple-of-128) feature dims; 8-aligned batch tile.
    Zp, Hp, Op = (_round_up(d, 128) for d in (Z, H, O))
    TB = min(block_b, _round_up(B, 8))
    Bp = _round_up(B, TB)

    z_p = _pad2(z, Bp, Zp)
    w1_p = _pad2(w1, Zp, Hp).astype(compute_dtype)
    w2_p = _pad2(w2, Hp, Op).astype(compute_dtype)
    b1_p = _pad2(b1.reshape(1, -1).astype(jnp.float32), 1, Hp)
    b2_p = _pad2(b2.reshape(1, -1).astype(jnp.float32), 1, Op)

    grid = (Bp // TB,)

    out = pl.pallas_call(
        vae_decoder_kernel,
        out_shape=jax.ShapeDtypeStruct((Bp, Op), jnp.float32),
        grid_spec=pltpu.PrefetchScalarGridSpec(
            num_scalar_prefetch=0,
            grid=grid,
            in_specs=[
                # Streamed activation tile (double-buffered across the batch grid).
                pl.BlockSpec((TB, Zp), lambda i: (i, 0)),
                # Parameters: constant block index -> VMEM-resident, fetched once.
                pl.BlockSpec((Zp, Hp), lambda i: (0, 0)),
                pl.BlockSpec((1, Hp), lambda i: (0, 0)),
                pl.BlockSpec((Hp, Op), lambda i: (0, 0)),
                pl.BlockSpec((1, Op), lambda i: (0, 0)),
            ],
            out_specs=pl.BlockSpec((TB, Op), lambda i: (i, 0)),
        ),
        compiler_params=pltpu.CompilerParams(
            dimension_semantics=("parallel",),   # lets v7x shard batch tiles across its 2 TCs
        ),
    )(z_p, w1_p, b1_p, w2_p, b2_p)

    return out[:B, :O]


def reference(z, w1, b1, w2, b2):
    h = jax.nn.sigmoid(z @ w1 + b1.reshape(1, -1))
    return jax.nn.sigmoid(h @ w2 + b2.reshape(1, -1))


if __name__ == "__main__":
    # Small shapes consistent with the module: batch=4, z_dim=8, hidden=32, output=64
    B, Z, H, O = 4, 8, 32, 64

    key = jax.random.PRNGKey(0)
    kz, kw1, kb1, kw2, kb2 = jax.random.split(key, 5)

    z = jax.random.normal(kz, (B, Z), dtype=jnp.float32)

    # Deterministic parameter init (PyTorch-style uniform ranges), stored as [in, out].
    lim1 = 1.0 / jnp.sqrt(Z)
    w1 = jax.random.uniform(kw1, (Z, H), minval=-lim1, maxval=lim1, dtype=jnp.float32)
    b1 = jax.random.uniform(kb1, (1, H), minval=-lim1, maxval=lim1, dtype=jnp.float32)
    lim2 = 1.0 / jnp.sqrt(H)
    w2 = jax.random.uniform(kw2, (H, O), minval=-lim2, maxval=lim2, dtype=jnp.float32)
    b2 = jax.random.uniform(kb2, (1, O), minval=-lim2, maxval=lim2, dtype=jnp.float32)

    ref = reference(z, w1, b1, w2, b2)

    # f32 compute path: must match the PyTorch-equivalent reference tightly.
    out_f32 = vae_decoder(z, w1, b1, w2, b2, compute_dtype=jnp.float32)
    out_f32 = jax.block_until_ready(out_f32)
    assert out_f32.shape == (B, O)
    assert jnp.allclose(out_f32, ref, atol=1e-5, rtol=1e-5), "f32 mismatch vs reference"

    # bf16 matmul-input path (production throughput path): f32 accumulation keeps it close.
    out_bf16 = vae_decoder(z, w1, b1, w2, b2, compute_dtype=jnp.bfloat16)
    out_bf16 = jax.block_until_ready(out_bf16)
    assert out_bf16.shape == (B, O)
    assert jnp.allclose(out_bf16, ref, atol=2e-2, rtol=2e-2), "bf16 mismatch vs reference"

    print("KERNEL_OK")
</pallas_src>

<mosaic_0001>
module attributes {stable_mosaic.version = 11 : i64} {
  func.func @vae_decoder_kernel(%arg0: i32, %arg1: memref<8x128xf32, #tpu.memory_space<vmem>>, %arg2: memref<128x128xf32, #tpu.memory_space<vmem>>, %arg3: memref<1x128xf32, #tpu.memory_space<vmem>>, %arg4: memref<128x128xf32, #tpu.memory_space<vmem>>, %arg5: memref<1x128xf32, #tpu.memory_space<vmem>>, %arg6: memref<8x128xf32, #tpu.memory_space<vmem>>) attributes {dimension_semantics = [#tpu.dimension_semantics<parallel>], iteration_bounds = array<i64: 1>, scalar_prefetch = 0 : i64, scratch_operands = 0 : i64, tpu.core_type = #tpu.core_type<tc>, window_params = [{transform_indices = @transform_0, window_bounds = array<i64: 8, 128>}, {pipeline_mode = #tpu.pipeline_mode<synchronous>, transform_indices = @transform_1, window_bounds = array<i64: 128, 128>}, {pipeline_mode = #tpu.pipeline_mode<synchronous>, transform_indices = @transform_2, window_bounds = array<i64: 1, 128>}, {pipeline_mode = #tpu.pipeline_mode<synchronous>, transform_indices = @transform_3, window_bounds = array<i64: 128, 128>}, {pipeline_mode = #tpu.pipeline_mode<synchronous>, transform_indices = @transform_4, window_bounds = array<i64: 1, 128>}, {transform_indices = @transform_5, window_bounds = array<i64: 8, 128>}]} {
    %c0 = arith.constant 0 : index
    %c0_0 = arith.constant 0 : index
    %0 = vector.load %arg1[%c0, %c0_0] : memref<8x128xf32, #tpu.memory_space<vmem>>, vector<8x128xf32>
    %c0_1 = arith.constant 0 : index
    %c0_2 = arith.constant 0 : index
    %1 = vector.load %arg2[%c0_1, %c0_2] : memref<128x128xf32, #tpu.memory_space<vmem>>, vector<128x128xf32>
    %cst = arith.constant dense<0.000000e+00> : vector<8x128xf32>
    %2 = tpu.matmul %0, %1, %cst {dimension_numbers = #tpu.dot_dimension_numbers<[1], [0], [0], [1], [0, 0, 1, 1], [], []>} : vector<8x128xf32>, vector<128x128xf32>, vector<8x128xf32> -> vector<8x128xf32>
    %c0_3 = arith.constant 0 : index
    %c0_4 = arith.constant 0 : index
    %3 = vector.load %arg3[%c0_3, %c0_4] : memref<1x128xf32, #tpu.memory_space<vmem>>, vector<1x128xf32>
    %4 = vector.broadcast %3 : vector<1x128xf32> to vector<8x128xf32>
    %5 = arith.addf %2, %4 : vector<8x128xf32>
    %6 = arith.negf %5 : vector<8x128xf32>
    %7 = math.exp %6 : vector<8x128xf32>
    %cst_5 = arith.constant 1.000000e+00 : f32
    %8 = vector.broadcast %cst_5 : f32 to vector<8x128xf32>
    %9 = arith.addf %8, %7 : vector<8x128xf32>
    %10 = arith.divf %8, %9 : vector<8x128xf32>
    %c0_6 = arith.constant 0 : index
    %c0_7 = arith.constant 0 : index
    %11 = vector.load %arg4[%c0_6, %c0_7] : memref<128x128xf32, #tpu.memory_space<vmem>>, vector<128x128xf32>
    %cst_8 = arith.constant dense<0.000000e+00> : vector<8x128xf32>
    %12 = tpu.matmul %10, %11, %cst_8 {dimension_numbers = #tpu.dot_dimension_numbers<[1], [0], [0], [1], [0, 0, 1, 1], [], []>} : vector<8x128xf32>, vector<128x128xf32>, vector<8x128xf32> -> vector<8x128xf32>
    %c0_9 = arith.constant 0 : index
    %c0_10 = arith.constant 0 : index
    %13 = vector.load %arg5[%c0_9, %c0_10] : memref<1x128xf32, #tpu.memory_space<vmem>>, vector<1x128xf32>
    %14 = vector.broadcast %13 : vector<1x128xf32> to vector<8x128xf32>
    %15 = arith.addf %12, %14 : vector<8x128xf32>
    %16 = arith.negf %15 : vector<8x128xf32>
    %17 = math.exp %16 : vector<8x128xf32>
    %cst_11 = arith.constant 1.000000e+00 : f32
    %18 = vector.broadcast %cst_11 : f32 to vector<8x128xf32>
    %19 = arith.addf %18, %17 : vector<8x128xf32>
    %20 = arith.divf %18, %19 : vector<8x128xf32>
    %c0_12 = arith.constant 0 : index
    %c0_13 = arith.constant 0 : index
    %21 = vector.load %arg6[%c0_12, %c0_13] : memref<8x128xf32, #tpu.memory_space<vmem>>, vector<8x128xf32>
    tpu.vector_store %arg6[%c0_12, %c0_13], %20 {strides = array<i32>} : memref<8x128xf32, #tpu.memory_space<vmem>>, vector<8x128xf32>,
    return
  }
  func.func @transform_0(%arg0: i32) -> (i32, i32) {
    %c0_i32 = arith.constant 0 : i32
    %c0_i32_0 = arith.constant 0 : i32
    return %arg0, %c0_i32 : i32, i32
  }
  func.func @transform_1(%arg0: i32) -> (i32, i32) {
    %c0_i32 = arith.constant 0 : i32
    %c0_i32_0 = arith.constant 0 : i32
    %c0_i32_1 = arith.constant 0 : i32
    return %c0_i32, %c0_i32_0 : i32, i32
  }
  func.func @transform_2(%arg0: i32) -> (i32, i32) {
    %c0_i32 = arith.constant 0 : i32
    %c0_i32_0 = arith.constant 0 : i32
    %c0_i32_1 = arith.constant 0 : i32
    return %c0_i32, %c0_i32_0 : i32, i32
  }
  func.func @transform_3(%arg0: i32) -> (i32, i32) {
    %c0_i32 = arith.constant 0 : i32
    %c0_i32_0 = arith.constant 0 : i32
    %c0_i32_1 = arith.constant 0 : i32
    return %c0_i32, %c0_i32_0 : i32, i32
  }
  func.func @transform_4(%arg0: i32) -> (i32, i32) {
    %c0_i32 = arith.constant 0 : i32
    %c0_i32_0 = arith.constant 0 : i32
    %c0_i32_1 = arith.constant 0 : i32
    return %c0_i32, %c0_i32_0 : i32, i32
  }
  func.func @transform_5(%arg0: i32) -> (i32, i32) {
    %c0_i32 = arith.constant 0 : i32
    %c0_i32_0 = arith.constant 0 : i32
    return %arg0, %c0_i32 : i32, i32
  }
}

</mosaic_0001>

<bundles_post_ra>
// kernel: tpu_custom_call.1
= control target key start
LH: loop header
LB: loop body
LE: loop exit
PB: predicated region body
PF: predicated region fallthrough
CT: control target
= control target key end

     0   :  { %10 = vsyncpa [#allocation3], 0  ;;  %s378_s0 = inlined_call_operand.hbm [shape: f32[8,128], index: 0, kind: input, shape index: {}]   ;;  %s379_s1 = inlined_call_operand.hbm [shape: f32[128,128], index: 1, kind: input, shape index: {}]   ;;  %s380_s2 = inlined_call_operand.vmem [shape: f32[1,128], index: 2, kind: input, shape index: {}]   ;;  %s381_s3 = inlined_call_operand.hbm [shape: f32[128,128], index: 3, kind: input, shape index: {}]   ;;  %s382_s4 = inlined_call_operand.vmem [shape: f32[1,128], index: 4, kind: input, shape index: {}]   ;;  %s383_s5 = inlined_call_operand.hbm [shape: f32[8,128], index: 5, kind: output, shape index: {}]  }
   0x1   :  { %11 = vsyncpa [#allocation6], 0  ;;  %s28_s20 = sshll.u32 %s379_s1, 4  ;;  %s29_s20 = int_to_ptr.hbm [resolvable:$true] %s28_s20 }
   0x2   :  { %12 = vsyncpa [#allocation4], 0  ;;  %s324_s21 = smov [#allocation5]   ;;  %s18_s25 = sshll.u32 %s378_s0, 4  ;;  %s19_s25 = int_to_ptr.hbm [resolvable:$true] %s18_s25 }
   0x3   :  { %s30_s22 = sshll.u32 %s324_s21, 4  ;;  %s325_s26 = smov 128   ;;  %s31_s22 = int_to_ptr.vmem [resolvable:$true] %s30_s22 }
   0x4   :  { %s326_s27 = smov 8   ;;  %s327_s28 = smov [#allocation2]  }
   0x5   :  { %36 = dma.hbm_to_vmem [thread:$0]  %s29_s20, 2048, %s31_s22, [#allocation6], %s325_s26, %s325_s26, %s326_s27  }
   0x6   :  { %s20_s29 = sshll.u32 %s327_s28, 4  ;;  %s43_s7 = sshll.u32 %s381_s3, 4  ;;  %s21_s29 = int_to_ptr.vmem [resolvable:$true] %s20_s29  ;;  %s44_s7 = int_to_ptr.hbm [resolvable:$true] %s43_s7 }
   0x7   :  { %23 = dma.hbm_to_vmem [thread:$0]  %s19_s25, 128, %s21_s29, [#allocation3]  }
   0x8   :  { %s328_s1 = smov [#allocation7]  }
   0x9   :  { %s45_s8 = sshll.u32 %s328_s1, 4  ;;  %s46_s8 = int_to_ptr.vmem [resolvable:$true] %s45_s8 }
   0xa   :  { %51 = dma.hbm_to_vmem [thread:$0]  %s44_s7, 2048, %s46_s8, [#allocation6], %s325_s26, %s325_s26, %s326_s27  }
   0xb   :  { %318 = dma.done.wait [#allocation3], 128  }
   0xc   :  { %319 = vsyncadd [#allocation3], 4294967168 }
   0xd   :  { %320 = dma.done.wait [#allocation6], 4096  }
   0xe   :  { %321 = vsyncadd [#allocation6], 4294963200  ;;  %v82_v0 = vld [vmem:[#allocation5 + $0x78] sm:$0xff]  ;;  %v81_v1 = vld [vmem:[#allocation5 + $0x70] sm:$0xff]  ;;  %s329_s10 = smov [#allocation8]  }
   0xf   :  { %87 = vmatpush.msra.mxu0 %v82_v0  ;;  %v80_v2 = vld [vmem:[#allocation5 + $0x68] sm:$0xff]  ;;  %v79_v3 = vld [vmem:[#allocation5 + $0x60] sm:$0xff]  ;;  %v78_v4 = vld [vmem:[#allocation5 + $0x58] sm:$0xff]  ;;  %s191_s11 = sshll.u32 %s329_s10, 4  ;;  %s192_s11 = int_to_ptr.vmem [resolvable:$true] %s191_s11 }
  0x10   :  { %v77_v5 = vld [vmem:[#allocation5 + $0x50] sm:$0xff]  ;;  %v76_v6 = vld [vmem:[#allocation5 + $0x48] sm:$0xff]  ;;  %v75_v7 = vld [vmem:[#allocation5 + $0x40] sm:$0xff] }
  0x11   :  { %88 = vmatpush.msra.mxu0 %v81_v1  ;;  %v74_v8 = vld [vmem:[#allocation5 + $0x38] sm:$0xff]  ;;  %v73_v9 = vld [vmem:[#allocation5 + $0x30] sm:$0xff]  ;;  %v72_v10 = vld [vmem:[#allocation5 + $0x28] sm:$0xff] }
  0x12   :  { %v71_v11 = vld [vmem:[#allocation5 + $0x20] sm:$0xff]  ;;  %v70_v12 = vld [vmem:[#allocation5 + $0x18] sm:$0xff]  ;;  %v69_v13 = vld [vmem:[#allocation5 + $0x10] sm:$0xff] }
  0x13   :  { %89 = vmatpush.msra.mxu0 %v80_v2  ;;  %v68_v14 = vld [vmem:[#allocation5 + $0x8] sm:$0xff]  ;;  %v67_v15 = vld [vmem:[#allocation5] sm:$0xff]  ;;  %v66_v16 = vld [vmem:[#allocation2] sm:$0xff] }
  0x14   :  { %v141_v17 = vld [vmem:[#allocation7 + $0x78] sm:$0xff]  ;;  %v140_v18 = vld [vmem:[#allocation7 + $0x70] sm:$0xff]  ;;  %v139_v19 = vld [vmem:[#allocation7 + $0x68] sm:$0xff] }
  0x15   :  { %90 = vmatpush.msra.mxu0 %v79_v3  ;;  %146 = vmatpush.msra.mxu1 %v141_v17  ;;  %v138_v20 = vld [vmem:[#allocation7 + $0x60] sm:$0xff]  ;;  %v137_v21 = vld [vmem:[#allocation7 + $0x58] sm:$0xff]  ;;  %v136_v22 = vld [vmem:[#allocation7 + $0x50] sm:$0xff] }
  0x16   :  { %v135_v23 = vld [vmem:[#allocation7 + $0x48] sm:$0xff]  ;;  %v134_v24 = vld [vmem:[#allocation7 + $0x40] sm:$0xff]  ;;  %v133_v25 = vld [vmem:[#allocation7 + $0x38] sm:$0xff] }
  0x17   :  { %91 = vmatpush.msra.mxu0 %v78_v4  ;;  %147 = vmatpush.msra.mxu1 %v140_v18  ;;  %v132_v26 = vld [vmem:[#allocation7 + $0x30] sm:$0xff]  ;;  %v131_v27 = vld [vmem:[#allocation7 + $0x28] sm:$0xff]  ;;  %v130_v28 = vld [vmem:[#allocation7 + $0x20] sm:$0xff] }
  0x18   :  { %v129_v29 = vld [vmem:[#allocation7 + $0x18] sm:$0xff]  ;;  %v128_v30 = vld [vmem:[#allocation7 + $0x10] sm:$0xff]  ;;  %v127_v31 = vld [vmem:[#allocation7 + $0x8] sm:$0xff] }
  0x19   :  { %92 = vmatpush.msra.mxu0 %v77_v5  ;;  %148 = vmatpush.msra.mxu1 %v139_v19  ;;  %v126_v32 = vld [vmem:[#allocation7] sm:$0xff]  ;;  %v212_v33 = vld [vmem:[%s380_s2] ss:$0 sm:$0xff] }
  0x1a   :  { %v213_v49 = vld [vmem:[%s382_s4] ss:$0 sm:$0xff]  ;;  %s193_s4 = sshll.u32 %s383_s5, 4  ;;  %s194_s4 = int_to_ptr.hbm [resolvable:$true] %s193_s4 }
  0x1b   :  { %93 = vmatpush.msra.mxu0 %v76_v6  ;;  %149 = vmatpush.msra.mxu1 %v138_v20 }
  0x1d   :  { %94 = vmatpush.msra.mxu0 %v75_v7  ;;  %150 = vmatpush.msra.mxu1 %v137_v21 }
  0x1f   :  { %95 = vmatpush.msra.mxu0 %v74_v8  ;;  %151 = vmatpush.msra.mxu1 %v136_v22 }
  0x21   :  { %96 = vmatpush.msra.mxu0 %v73_v9  ;;  %152 = vmatpush.msra.mxu1 %v135_v23 }
  0x23   :  { %97 = vmatpush.msra.mxu0 %v72_v10  ;;  %153 = vmatpush.msra.mxu1 %v134_v24 }
  0x25   :  { %98 = vmatpush.msra.mxu0 %v71_v11  ;;  %154 = vmatpush.msra.mxu1 %v133_v25 }
  0x27   :  { %99 = vmatpush.msra.mxu0 %v70_v12  ;;  %155 = vmatpush.msra.mxu1 %v132_v26 }
  0x29   :  { %100 = vmatpush.msra.mxu0 %v69_v13  ;;  %156 = vmatpush.msra.mxu1 %v131_v27 }
  0x2b   :  { %101 = vmatpush.msra.mxu0 %v68_v14  ;;  %157 = vmatpush.msra.mxu1 %v130_v28 }
  0x2d   :  { %102 = vmatpush.msra.mxu0 %v67_v15  ;;  %158 = vmatpush.msra.mxu1 %v129_v29 }
  0x2e   :  { %103 = vmatmul.f32.vlgmr.msra.gmra.mxu0 %v66_v16 }
  0x2f   :  { %159 = vmatpush.msra.mxu1 %v128_v30 }
  0x31   :  { %160 = vmatpush.msra.mxu1 %v127_v31 }
  0x33   :  { %161 = vmatpush.msra.mxu1 %v126_v32 }
  0xab   :  { %v104_v34 = vpop.f32.mrf.mxu0 }
  0xac   :  { %v105_v35 = vadd.f32 %v212_v33, %v104_v34 }
  0xae   :  { %v204_v36 = vmul.f32 -1.442695, %v105_v35 }
  0xb0   :  { %214 = vpow2.f32 %v204_v36 }
  0xb6   :  { %v215_v37 = vpop.eup %214 }
  0xb7   :  { %v110_v38 = vadd.f32 1.0, %v215_v37 }
  0xb9   :  { %216 = vrcp.f32 %v110_v38  ;;  %v122_v42 = vand.u32 2147483648, %v110_v38  ;;  %v120_v44 = vand.u32 2147483647, %v110_v38  ;;  %vm116_vm1 = vweird.f32 %v110_v38 }
  0xbb   :  { %v123_v46 = vor.u32 1.1754944e-38, %v122_v42  ;;  %vm121_vm3 = vcmp.eq.f32.partialorder %v120_v44, 8.507059e+37 }
  0xbf   :  { %v217_v39 = vpop.eup %216 }
  0xc0   :  { %v112_v40 = vmul.f32 %v217_v39, %v110_v38  ;;  %vm117_vm0 = vweird.f32 %v217_v39 }
  0xc1   :  { %vm118_vm2 = vmor %vm116_vm1, %vm117_vm0 }
  0xc2   :  { %v113_v41 = vsub.f32 1.0, %v112_v40 }
  0xc4   :  { %v114_v43 = vmul.f32 %v217_v39, %v113_v41 }
  0xc6   :  { %v115_v45 = vadd.f32 %v217_v39, %v114_v43 }
  0xc8   :  { %v119_v47 = vsel %vm118_vm2, %v217_v39, %v115_v45 }
  0xc9   :  { %v124_v48 = vsel %vm121_vm3, %v123_v46, %v119_v47 }
  0xca   :  { %162 = vmatmul.f32.vlgmr.msra.gmra.mxu1 %v124_v48 }
 0x147   :  { %v163_v50 = vpop.f32.mrf.mxu1 }
 0x148   :  { %v164_v51 = vadd.f32 %v213_v49, %v163_v50 }
 0x14a   :  { %v205_v52 = vmul.f32 -1.442695, %v164_v51 }
 0x14c   :  { %218 = vpow2.f32 %v205_v52 }
 0x152   :  { %v219_v53 = vpop.eup %218 }
 0x153   :  { %v169_v54 = vadd.f32 1.0, %v219_v53 }
 0x155   :  { %220 = vrcp.f32 %v169_v54  ;;  %v181_v58 = vand.u32 2147483648, %v169_v54  ;;  %v179_v60 = vand.u32 2147483647, %v169_v54  ;;  %vm175_vm5 = vweird.f32 %v169_v54 }
 0x157   :  { %v182_v62 = vor.u32 1.1754944e-38, %v181_v58  ;;  %vm180_vm7 = vcmp.eq.f32.partialorder %v179_v60, 8.507059e+37 }
 0x15b   :  { %v221_v55 = vpop.eup %220 }
 0x15c   :  { %v171_v56 = vmul.f32 %v221_v55, %v169_v54  ;;  %vm176_vm4 = vweird.f32 %v221_v55 }
 0x15d   :  { %vm177_vm6 = vmor %vm175_vm5, %vm176_vm4 }
 0x15e   :  { %v172_v57 = vsub.f32 1.0, %v171_v56 }
 0x160   :  { %v173_v59 = vmul.f32 %v221_v55, %v172_v57 }
 0x162   :  { %v174_v61 = vadd.f32 %v221_v55, %v173_v59 }
 0x164   :  { %v178_v63 = vsel %vm177_vm6, %v221_v55, %v174_v61 }
 0x165   :  { %v183_v0 = vsel %vm180_vm7, %v182_v62, %v178_v63 }
 0x166   :  { %185 = vst [vmem:[#allocation8] sm:$0xff] %v183_v0 }
 0x167   :  { %196 = dma.vmem_to_hbm [thread:$0]  %s192_s11, 128, %s194_s4, [#allocation4]  }
 0x168   :  { %322 = dma.done.wait [#allocation4], 128  }
 0x169   :  { %323 = vsyncadd [#allocation4], 4294967168 }
 0x16a   :  { %201 = vsyncpa [#allocation3], 1 }
 0x16b   :  { %202 = vsyncpa [#allocation6], 1 }
 0x16c   :  { %203 = vsyncpa [#allocation4], 1 }

</bundles_post_ra>
